<compile_context>
chip_gen: v7x
topology: tpu7x:2x2x1
jax: 0.10.0
libtpu: 0.0.40
codegen_flags: <defaults>
</compile_context>

<pallas_src>
import jax
import jax.numpy as jnp
from jax.experimental import pallas as pl
from jax.experimental.pallas import tpu as pltpu


def reward_model_kernel(xT_ref, w1T_ref, b1_ref, w2_ref, b2_ref, o_ref):
    # xT: (D, TB)  w1T: (H, D)  b1: (H, 1)  w2: (1, H)  b2: (1, 1) in SMEM
    # o:  (1, TB)  -- lane-dense output row.
    hT = jnp.dot(w1T_ref[...], xT_ref[...], preferred_element_type=jnp.float32)
    hT = jnp.maximum(hT + b1_ref[...], 0.0)            # bias + ReLU on the VPU
    # H -> 1 projection on the (idle) MXU; result is a full-width row.
    out = jnp.dot(w2_ref[...], hT, preferred_element_type=jnp.float32)
    o_ref[...] = (out + b2_ref[0, 0]).astype(o_ref.dtype)


def reward_model_forward(x, w1, b1, w2, b2, *, batch_tile=None):
    """Forward pass of RewardModel.

    x:  (B, D) float32
    w1: (D, H) float32   (transposed vs. PyTorch fc1.weight)
    b1: (H,)   float32
    w2: (H, 1) float32   (transposed vs. PyTorch fc2.weight)
    b2: (1,)   float32
    Returns (B, 1) float32.
    """
    B, D = x.shape
    H = w1.shape[1]

    # One-time, tiny relayouts handled by XLA outside the kernel.
    xT = x.T                       # (D, B): batch on the lane axis
    w1T = w1.T                     # (H, D)
    b1_col = b1.reshape(H, 1)
    w2_row = w2.reshape(1, H)
    b2_2d = b2.reshape(1, 1)

    def round_down_128(v):
        return (v // 128) * 128

    if batch_tile is None:
        # Big tiles amortize the ~0.35 us per-grid-step overhead; with batch on
        # the lane axis a 16384-wide x block is only ~D*64 KiB (2 MiB at D=32).
        tb = min(B, 16384)
        # Keep >= 2 grid steps for large batches so both v7x TCs get work
        # (harmless single extra step on 1-TC v5e/v6e).
        if B > 2 * 128:
            tb = min(tb, max(128, round_down_128(pl.cdiv(B, 2))))
        batch_tile = tb

    TB = min(batch_tile, B)        # never exceed the array (tail is clipped)
    if TB != B:
        TB = round_down_128(TB)    # lane axis => 128-aligned tiles
        if TB < 128:
            TB = B                 # tiny batches: one full-width block

    grid = (pl.cdiv(B, TB),)

    out_row = pl.pallas_call(
        reward_model_kernel,
        out_shape=jax.ShapeDtypeStruct((1, B), jnp.float32),
        grid=grid,
        in_specs=[
            # x (transposed) is tiled over the batch -> pipelined HBM reads.
            pl.BlockSpec((D, TB), lambda i: (0, i)),
            # Weights / biases stay VMEM-resident across all grid steps.
            pl.BlockSpec((H, D), lambda i: (0, 0)),
            pl.BlockSpec((H, 1), lambda i: (0, 0)),
            pl.BlockSpec((1, H), lambda i: (0, 0)),
            # Scalar output bias lives in SMEM.
            pl.BlockSpec(memory_space=pltpu.MemorySpace.SMEM),
        ],
        out_specs=pl.BlockSpec((1, TB), lambda i: (0, i)),
        compiler_params=pltpu.CompilerParams(
            # Independent batch tiles -> shard across TensorCores on v7x.
            dimension_semantics=("parallel",),
            vmem_limit_bytes=32 * 1024 * 1024,
        ),
    )(xT, w1T, b1_col, w2_row, b2_2d)

    # (1, B) row -> PyTorch-style (B, 1) column.
    return out_row.reshape(B, 1)


if __name__ == "__main__":
    key = jax.random.PRNGKey(0)
    k_x, k_w1, k_b1, k_w2, k_b2 = jax.random.split(key, 5)

    batch = 256       # small demo batch; batch_tile=128 -> 2-step grid
    input_size = 32   # "state" feature size for the reward model
    hidden = 64       # fixed by the module definition

    # Deterministic parameter init (uniform, similar in spirit to PyTorch default).
    bound1 = 1.0 / jnp.sqrt(input_size)
    bound2 = 1.0 / jnp.sqrt(hidden)
    w1 = jax.random.uniform(k_w1, (input_size, hidden), jnp.float32, -bound1, bound1)
    b1 = jax.random.uniform(k_b1, (hidden,), jnp.float32, -bound1, bound1)
    w2 = jax.random.uniform(k_w2, (hidden, 1), jnp.float32, -bound2, bound2)
    b2 = jax.random.uniform(k_b2, (1,), jnp.float32, -bound2, bound2)

    x = jax.random.normal(k_x, (batch, input_size), jnp.float32)

    # Small explicit batch_tile to exercise the multi-step (megacore-shardable)
    # grid path; production callers can rely on the default.
    out = reward_model_forward(x, w1, b1, w2, b2, batch_tile=128)
    out = jax.block_until_ready(out)

    # Reference check in plain JAX.
    ref = jnp.maximum(x @ w1 + b1, 0.0) @ w2 + b2.reshape(1, 1)
    assert out.shape == (batch, 1)
    assert jnp.allclose(out, ref, atol=1e-5, rtol=1e-5)

    print("KERNEL_OK")
</pallas_src>

<mosaic_0001>
module attributes {stable_mosaic.version = 11 : i64} {
  func.func @reward_model_kernel(%arg0: i32, %arg1: memref<32x128xf32, #tpu.memory_space<vmem>>, %arg2: memref<64x32xf32, #tpu.memory_space<vmem>>, %arg3: memref<64x1xf32, #tpu.memory_space<vmem>>, %arg4: memref<1x64xf32, #tpu.memory_space<vmem>>, %arg5: memref<1x1xf32, #tpu.memory_space<smem>>, %arg6: memref<1x128xf32, #tpu.memory_space<vmem>>) attributes {dimension_semantics = [#tpu.dimension_semantics<parallel>], iteration_bounds = array<i64: 2>, scalar_prefetch = 0 : i64, scratch_operands = 0 : i64, tpu.core_type = #tpu.core_type<tc>, window_params = [{transform_indices = @transform_0, window_bounds = array<i64: 32, 128>}, {pipeline_mode = #tpu.pipeline_mode<synchronous>, transform_indices = @transform_1, window_bounds = array<i64: 64, 32>}, {pipeline_mode = #tpu.pipeline_mode<synchronous>, transform_indices = @transform_2, window_bounds = array<i64: 64, 1>}, {pipeline_mode = #tpu.pipeline_mode<synchronous>, transform_indices = @transform_3, window_bounds = array<i64: 1, 64>}, {transform_indices = @transform_4, window_bounds = array<i64: 1, 1>}, {transform_indices = @transform_5, window_bounds = array<i64: 1, 128>}]} {
    %c0 = arith.constant 0 : index
    %c0_0 = arith.constant 0 : index
    %0 = vector.load %arg2[%c0, %c0_0] : memref<64x32xf32, #tpu.memory_space<vmem>>, vector<64x32xf32>
    %c0_1 = arith.constant 0 : index
    %c0_2 = arith.constant 0 : index
    %1 = vector.load %arg1[%c0_1, %c0_2] : memref<32x128xf32, #tpu.memory_space<vmem>>, vector<32x128xf32>
    %cst = arith.constant dense<0.000000e+00> : vector<64x128xf32>
    %2 = tpu.matmul %0, %1, %cst {dimension_numbers = #tpu.dot_dimension_numbers<[1], [0], [0], [1], [0, 0, 1, 1], [], []>} : vector<64x32xf32>, vector<32x128xf32>, vector<64x128xf32> -> vector<64x128xf32>
    %c0_3 = arith.constant 0 : index
    %c0_4 = arith.constant 0 : index
    %3 = vector.load %arg3[%c0_3, %c0_4] : memref<64x1xf32, #tpu.memory_space<vmem>>, vector<64x1xf32>
    %4 = vector.broadcast %3 : vector<64x1xf32> to vector<64x128xf32>
    %5 = arith.addf %2, %4 : vector<64x128xf32>
    %cst_5 = arith.constant 0.000000e+00 : f32
    %6 = vector.broadcast %cst_5 : f32 to vector<64x128xf32>
    %7 = arith.maximumf %5, %6 : vector<64x128xf32>
    %c0_6 = arith.constant 0 : index
    %c0_7 = arith.constant 0 : index
    %8 = vector.load %arg4[%c0_6, %c0_7] : memref<1x64xf32, #tpu.memory_space<vmem>>, vector<1x64xf32>
    %cst_8 = arith.constant dense<0.000000e+00> : vector<1x128xf32>
    %9 = tpu.matmul %8, %7, %cst_8 {dimension_numbers = #tpu.dot_dimension_numbers<[1], [0], [0], [1], [0, 0, 1, 1], [], []>} : vector<1x64xf32>, vector<64x128xf32>, vector<1x128xf32> -> vector<1x128xf32>
    %c0_9 = arith.constant 0 : index
    %c0_10 = arith.constant 0 : index
    %10 = memref.load %arg5[%c0_9, %c0_10] : memref<1x1xf32, #tpu.memory_space<smem>>
    %11 = vector.broadcast %10 : f32 to vector<1x128xf32>
    %12 = arith.addf %9, %11 : vector<1x128xf32>
    %c0_11 = arith.constant 0 : index
    %c0_12 = arith.constant 0 : index
    %13 = vector.load %arg6[%c0_11, %c0_12] : memref<1x128xf32, #tpu.memory_space<vmem>>, vector<1x128xf32>
    tpu.vector_store %arg6[%c0_11, %c0_12], %12 {strides = array<i32>} : memref<1x128xf32, #tpu.memory_space<vmem>>, vector<1x128xf32>,
    return
  }
  func.func @transform_0(%arg0: i32) -> (i32, i32) {
    %c0_i32 = arith.constant 0 : i32
    %c0_i32_0 = arith.constant 0 : i32
    return %c0_i32, %arg0 : i32, i32
  }
  func.func @transform_1(%arg0: i32) -> (i32, i32) {
    %c0_i32 = arith.constant 0 : i32
    %c0_i32_0 = arith.constant 0 : i32
    %c0_i32_1 = arith.constant 0 : i32
    return %c0_i32, %c0_i32_0 : i32, i32
  }
  func.func @transform_2(%arg0: i32) -> (i32, i32) {
    %c0_i32 = arith.constant 0 : i32
    %c0_i32_0 = arith.constant 0 : i32
    %c0_i32_1 = arith.constant 0 : i32
    return %c0_i32, %c0_i32_0 : i32, i32
  }
  func.func @transform_3(%arg0: i32) -> (i32, i32) {
    %c0_i32 = arith.constant 0 : i32
    %c0_i32_0 = arith.constant 0 : i32
    %c0_i32_1 = arith.constant 0 : i32
    return %c0_i32, %c0_i32_0 : i32, i32
  }
  func.func @transform_4(%arg0: i32) -> (i32, i32) {
    %c0_i32 = arith.constant 0 : i32
    %c0_i32_0 = arith.constant 0 : i32
    %c0_i32_1 = arith.constant 0 : i32
    return %c0_i32, %c0_i32_0 : i32, i32
  }
  func.func @transform_5(%arg0: i32) -> (i32, i32) {
    %c0_i32 = arith.constant 0 : i32
    %c0_i32_0 = arith.constant 0 : i32
    return %c0_i32, %arg0 : i32, i32
  }
}

</mosaic_0001>

<bundles_post_ra>
// kernel: tpu_custom_call.1
= control target key start
LH: loop header
LB: loop body
LE: loop exit
PB: predicated region body
PF: predicated region fallthrough
CT: control target
= control target key end

     0   :  { %s1034_s0 = inlined_call_operand.vmem [shape: f32[32,256], index: 0, kind: input, shape index: {}]   ;;  %s1035_s1 = inlined_call_operand.vmem [shape: f32[64,32], index: 1, kind: input, shape index: {}]   ;;  %s1036_s2 = inlined_call_operand.vmem [shape: f32[64,1], index: 2, kind: input, shape index: {}]   ;;  %s1037_s3 = inlined_call_operand.vmem [shape: f32[1,64], index: 3, kind: input, shape index: {}]   ;;  %s1038_s4 = inlined_call_operand.<no memory space> [shape: f32[1,1], index: 4, kind: input, shape index: {}]   ;;  %s1039_s5 = inlined_call_operand.hbm [shape: f32[1,256], index: 5, kind: output, shape index: {}]  }
   0x1   :  { %10 = sst [smem:[#allocation2]] %s1038_s4 }
   0x2   :  { %11 = vsyncpa [#allocation5], 0 }
   0x3   :  { %13 = vsyncpa [#allocation5 + $0x1], 0  ;;  %s865_s20 = smov 0   ;;  %s867_s21 = smov 0  }
   0x4   :  { %s869_s22 = smov 0   ;;  %s871_s23 = smov 0  }
   0x5 LB: > { %s618_s4 = sadd.s32 4294967295, %s825_s23   ;;  %s619_s24 = sadd.s32 4294967294, %s825_s23   ;;  %s825_s23 = sphi %s871_s23, %s1045_s23   ;;  %s821_s22 = sphi %s869_s22, %s1044_s22   ;;  %s817_s21 = sphi %s867_s21, %s1043_s21   ;;  %s813_s20 = sphi %s865_s20, %s1042_s20  }
   0x6   : > { %s888_s25 = sadd.s32 1, %s825_s23   ;;  %s26_s26 = sadd.s32 1, %s821_s22 }
   0x7   : > { %s23_s27 = ssub.s32 %s825_s23, %s888_s25  ;;  %p33_p0 = scmp.ne.s32.totalorder %s821_s22, %s817_s21 }
   0x8   : > { %p24_p1 = scmp.eq.s32.totalorder %s23_s27, 0  ;;  %p34_p2 = scmp.eq.s32.totalorder %s825_s23, 0 }
   0x9   : > { %p147_p3 = scmp.eq.s32.totalorder %s618_s4, 1  ;;  %p152_p4 = scmp.ne.s32.totalorder %s817_s21, %s813_s20 }
   0xa   : > { %s901_s28 = scalar_select %p24_p1, %s821_s22, %s26_s26  }
   0xb   : > { %p35_p5 = por %p34_p2, %p33_p0  ;;  %p903_p6 = por %p147_p3, %p33_p0 }
   0xc   : > { %p153_p7 = scmp.eq.s32.totalorder %s619_s24, 1  ;;  %p621_p9 = scmp.ge.s32.totalorder %s825_s23, 2 }
   0xe   : > { %p907_p8 = por %p153_p7, %p152_p4  ;;  %181 = sbr.rel (%p621_p9) target bundleno = 28 (0x1c), region = 32 }
  0x15   : > { %184 = sbr.rel (!%p35_p5) target bundleno = 28 (0x1c), region = 36  ;;  %s186_s6 = sand.u32 (%p35_p5), 1, %s821_s22  }
  0x16   : > { %s623_s7 = sshll.u32 (%p35_p5), %s825_s23, 3  ;;  %s622_s8 = sshll.u32 (%p35_p5), %s186_s6, 5 }
  0x17   : > { %s190_s11 = scalar_lea.vmem (%p35_p5), %s1034_s0, %s623_s7  ;;  %s188_s12 = scalar_lea.vmem (%p35_p5), [#allocation3], %s622_s8 }
  0x18   : > { %v224_v0 = vld [vmem:[%s190_s11] sm:$0xff] (%p35_p5)  ;;  %v226_v1 = vld [vmem:[%s190_s11 + $0x10] sm:$0xff] (%p35_p5) }
  0x19   : > { %v228_v2 = vld [vmem:[%s190_s11 + $0x20] sm:$0xff] (%p35_p5)  ;;  %225 = vst [vmem:[%s188_s12] sm:$0xff] (%p35_p5), %v224_v0  ;;  %227 = vst [vmem:[%s188_s12 + $0x8] sm:$0xff] (%p35_p5), %v226_v1  ;;  %v230_v3 = vld [vmem:[%s190_s11 + $0x30] sm:$0xff] (%p35_p5) }
  0x1a   : > { %229 = vst [vmem:[%s188_s12 + $0x10] sm:$0xff] (%p35_p5), %v228_v2  ;;  %231 = vst [vmem:[%s188_s12 + $0x18] sm:$0xff] (%p35_p5), %v230_v3 }
  0x1c PF: > { %p624_p10 = scmp.ge.s32.totalorder %s825_s23, 1  ;;  %p236_p11 = scmp.lt.s32.totalorder %s825_s23, 3 }
  0x1e   : > { %p237_p12 = pnand %p624_p10, %p236_p11 }
  0x1f   : > { %s922_s13 = sand.u32 (!%p237_p12), 1, %s817_s21   ;;  %v269_v4 = vld [vmem:[%s1035_s1] sm:$0xff] (!%p237_p12)  ;;  %vm329_vm0 = vcmask (!%p237_p12), 261120   ;;  %v827_v5 = vmov (!%p237_p12), 0   ;;  %v283_v12 = vld [vmem:[%s1036_s2 + $0x10] sm:$0xff] (!%p237_p12)  ;;  %v282_v13 = vld [vmem:[%s1036_s2 + $0x8] sm:$0xff] (!%p237_p12) }
  0x20   : > { %240 = sbr.rel (%p237_p12) target bundleno = 507 (0x1fb), region = 74  ;;  %s625_s16 = sshll.u32 (!%p237_p12), %s922_s13, 5  ;;  %667 = vmatprep.mubr.msk.f32.mxu0 (!%p237_p12), %vm329_vm0, %v269_v4  ;;  %761 = vset.pattern.permute.xlu0 (!%p237_p12), %v827_v5  ;;  %v281_v6 = vld [vmem:[%s1036_s2] sm:$0xff] (!%p237_p12)  ;;  %v284_v15 = vld [vmem:[%s1036_s2 + $0x18] sm:$0xff] (!%p237_p12)  ;;  %v286_v17 = vld [vmem:[%s1036_s2 + $0x28] sm:$0xff] (!%p237_p12)  ;;  %v828_v27 = vmov (!%p237_p12), 0.0|0.0  }
  0x21   : > { %762 = vset.pattern.permute.xlu1 (!%p237_p12), %v827_v5  ;;  %s245_s19 = scalar_lea.vmem (!%p237_p12), [#allocation3], %s625_s16  ;;  %291 = vperm.xlu0 (!%p237_p12), %761, %v281_v6   ;;  %v285_v16 = vld [vmem:[%s1036_s2 + $0x20] sm:$0xff] (!%p237_p12)  ;;  %v270_v18 = vld [vmem:[%s1035_s1 + $0x8] sm:$0xff] (!%p237_p12)  ;;  %v271_v19 = vld [vmem:[%s1035_s1 + $0x10] sm:$0xff] (!%p237_p12)  ;;  %vm829_vm1 = vmmov (!%p237_p12), 0   ;;  %v830_v28 = vmov (!%p237_p12), 0.0  }
  0x22   : > { %v277_v7 = vld [vmem:[%s245_s19] sm:$0xff] (!%p237_p12)  ;;  %v278_v8 = vld [vmem:[%s245_s19 + $0x8] sm:$0xff] (!%p237_p12)  ;;  %v279_v9 = vld [vmem:[%s245_s19 + $0x10] sm:$0xff] (!%p237_p12)  ;;  %301 = vperm.xlu1 (!%p237_p12), %762, %v283_v12   ;;  %706 = vmatprep.subr.bf16.mxu1 (!%p237_p12), %v828_v27  ;;  %vm470_vm2 = vcmask (!%p237_p12), 523264   ;;  %s468_s18 = sld [smem:[#allocation2]] (!%p237_p12)  ;;  %s268_s24 = scalar_lea.vmem (!%p237_p12), [#allocation4], %s922_s13 }
  0x23   : > { %v698_v10 = vpack.c.bf16 (!%p237_p12), %v278_v8, %v277_v7  ;;  %v280_v11 = vld [vmem:[%s245_s19 + $0x18] sm:$0xff] (!%p237_p12)  ;;  %v287_v20 = vld [vmem:[%s1036_s2 + $0x30] sm:$0xff] (!%p237_p12)  ;;  %v273_v23 = vld [vmem:[%s1035_s1 + $0x20] sm:$0xff] (!%p237_p12)  ;;  %695 = vmatprep.mubr.msk.f32.mxu1 (!%p237_p12), %vm829_vm1, %v830_v28  ;;  %s635_s19 = sshll.u32 (!%p237_p12), %s618_s4, 4  ;;  %s558_s26 = sshll.u32 (!%p237_p12), %s268_s24, 4  ;;  %s992_s26 = int_to_ptr.vmem [resolvable:$true] %s558_s26 }
  0x24   : > { %v702_v14 = vpack.c.bf16 (!%p237_p12), %v280_v11, %v279_v9  ;;  %v288_v21 = vld [vmem:[%s1036_s2 + $0x38] sm:$0xff] (!%p237_p12)  ;;  %v274_v24 = vld [vmem:[%s1035_s1 + $0x28] sm:$0xff] (!%p237_p12)  ;;  %v275_v25 = vld [vmem:[%s1035_s1 + $0x30] sm:$0xff] (!%p237_p12)  ;;  %s990_s7 = scalar_lea.hbm (!%p237_p12), %s1039_s5, %s635_s19  ;;  %s546_s8 = scalar_lea.sflag (!%p237_p12), [#allocation5], %s922_s13 }
  0x25   : > { %699 = vmatprep.subr.bf16.mxu0 (!%p237_p12), %v698_v10  ;;  %296 = vperm.xlu0 (!%p237_p12), %761, %v282_v13   ;;  %v272_v22 = vld [vmem:[%s1035_s1 + $0x18] sm:$0xff] (!%p237_p12)  ;;  %v467_v1 = vld [vmem:[%s1037_s3] sm:$0x1] (!%p237_p12)  ;;  %s763_s9 = scalar_lea.vmem (!%p237_p12), %s992_s26, 16  ;;  %s831_s4 = smov (!%p237_p12), [#allocation4]  }
  0x26   : > { %701 = vmatpush3.bf16.msra.mxu0 (!%p237_p12), %v698_v10  ;;  %306 = vperm.xlu1 (!%p237_p12), %762, %v284_v15   ;;  %v276_v26 = vld [vmem:[%s1035_s1 + $0x38] sm:$0xff] (!%p237_p12)  ;;  %p764_p13 = scmp.ne.s32.totalorder (!%p237_p12), %s992_s26, %s763_s9  ;;  %s767_s10 = sshll.u32 (!%p237_p12), %s831_s4, 4  ;;  %s768_s10 = int_to_ptr.vmem [resolvable:$false] %s767_s10 }
  0x27   : > { %703 = vmatprep.subr.bf16.mxu0 %v702_v14  ;;  %s769_s11 = scalar_lea.vmem %s768_s10, 32  ;;  %p770_p2 = scmp.lt.s32.totalorder %s992_s26, %s768_s10 }
  0x28   : > { %v469_v2 = vstv %s468_s18  ;;  %p765_p0 = pnand %p764_p13, %p903_p6  ;;  %p771_p3 = scmp.lt.s32.totalorder %s769_s11, %s763_s9 }
  0x29   : > { %311 = vperm.xlu0 %761, %v285_v16  }
  0x2a   : > { %705 = vmatpush3.bf16.msra.mxu0 %v702_v14  ;;  %316 = vperm.xlu1 %762, %v286_v17   ;;  %p766_p1 = pneg %p765_p0  ;;  %p772_p4 = por %p771_p3, %p770_p2 }
  0x2c   : > { %p773_p5 = pnand %p772_p4, %p766_p1 }
  0x2d   : > { %668 = vmatmul.mubr.msk.f32.vlgmr.msra.gmra.mrb[0].mxu0 %vm329_vm0, %v270_v18  ;;  %321 = vperm.xlu0 %761, %v287_v20  }
  0x2e   : > { %670 = vmatprep.mubr.msk.f32.mxu0 %vm329_vm0, %v271_v19  ;;  %326 = vperm.xlu1 %762, %v288_v21  }
  0x31   : > { %671 = vmatmul.mubr.msk.f32.gmra.mrb[2].mxu0 %vm329_vm0, %v272_v22 }
  0x32   : > { %673 = vmatprep.mubr.msk.f32.mxu0 %vm329_vm0, %v273_v23 }
  0x35   : > { %674 = vmatmul.mubr.msk.f32.gmra.mrb[4].mxu0 %vm329_vm0, %v274_v24 }
  0x36   : > { %676 = vmatprep.mubr.msk.f32.mxu0 %vm329_vm0, %v275_v25 }
  0x39   : > { %677 = vmatmul.mubr.msk.f32.gmra.mrb[6].mxu0 %vm329_vm0, %v276_v26 }
  0xa0   : > { %v292_v29 = vpop.permute.xlu0 %291 }
  0xa1   : > { %v302_v30 = vpop.permute.xlu1 %301 }
  0xa4   : > { %v297_v31 = vpop.permute.xlu0 %296 }
  0xa5   : > { %v307_v32 = vpop.permute.xlu1 %306 }
  0xa8   : > { %v312_v45 = vpop.permute.xlu0 %311 }
  0xa9   : > { %v317_v42 = vpop.permute.xlu1 %316 }
  0xac   : > { %v322_v57 = vpop.permute.xlu0 %321 }
  0xad   : > { %v327_v54 = vpop.permute.xlu1 %326 }
 0x100   : > { %v669_v33 = vpop.f32.mrb[0].mxu0 }
 0x101   : > { %v426_v34 = vadd.f32 %v669_v33, %v297_v31  ;;  %v420_v35 = vpop.f32.mrb[1].mxu0 }
 0x102   : > { %v421_v36 = vadd.f32 %v420_v35, %v292_v29 }
 0x103   : > { %v460_v37 = vmax.f32 %v426_v34, 0.0 }
 0x104   : > { %v459_v38 = vmax.f32 %v421_v36, 0.0  ;;  %v672_v39 = vpop.f32.mrb[2].mxu0 }
 0x105   : > { %v436_v40 = vadd.f32 %v672_v39, %v307_v32  ;;  %v430_v41 = vpop.f32.mrb[3].mxu0 }
 0x106   : > { %v431_v43 = vadd.f32 %v430_v41, %v302_v30  ;;  %v707_v44 = vpack.c.bf16 %v460_v37, %v459_v38 }
 0x107   : > { %v462_v46 = vmax.f32 %v436_v40, 0.0 }
 0x108   : > { %v461_v47 = vmax.f32 %v431_v43, 0.0  ;;  %v675_v48 = vpop.f32.mrb[4].mxu0  ;;  %708 = vmatpush3.bf16.msra.mxu1 %v707_v44 }
 0x109   : > { %v446_v49 = vadd.f32 %v675_v48, %v317_v42  ;;  %v440_v50 = vpop.f32.mrb[5].mxu0  ;;  %709 = vmatprep.subr.bf16.mxu1 %v828_v27 }
 0x10a   : > { %v710_v51 = vpack.c.bf16 %v462_v46, %v461_v47  ;;  %v441_v52 = vadd.f32 %v440_v50, %v312_v45 }
 0x10b   : > { %v464_v53 = vmax.f32 %v446_v49, 0.0 }
 0x10c   : > { %v463_v55 = vmax.f32 %v441_v52, 0.0  ;;  %v678_v56 = vpop.f32.mrb[6].mxu0  ;;  %711 = vmatpush3.bf16.msra.mxu1 %v710_v51 }
 0x10d   : > { %v456_v58 = vadd.f32 %v678_v56, %v327_v54  ;;  %v450_v59 = vpop.f32.mrb[7].mxu0  ;;  %712 = vmatprep.subr.bf16.mxu1 %v828_v27 }
 0x10e   : > { %v713_v60 = vpack.c.bf16 %v464_v53, %v463_v55  ;;  %v451_v61 = vadd.f32 %v450_v59, %v322_v57 }
 0x10f   : > { %v466_v62 = vmax.f32 %v456_v58, 0.0 }
 0x110   : > { %v465_v63 = vmax.f32 %v451_v61, 0.0  ;;  %714 = vmatpush3.bf16.msra.mxu1 %v713_v60 }
 0x111   : > { %715 = vmatprep.subr.bf16.mxu1 %v828_v27 }
 0x112   : > { %v716_v0 = vpack.c.bf16 %v466_v62, %v465_v63 }
 0x114   : > { %717 = vmatpush3.bf16.msra.mxu1 %v716_v0 }
 0x117   : > { %696 = vmatmul.mubr.msk.f32.vlgmr.msra.gmra.mrb[0].mxu1 %vm470_vm2, %v467_v1 }
 0x1ea   : > { %v540_v3 = vpop.f32.mrb[0].mxu1 }
 0x1eb   : > { %v541_v4 = vadd.f32 %v540_v3, %v469_v2  ;;  %v697_v5 = vpop.f32.mrb[1].mxu1 }
 0x1ed   : > { %544 = vst [vmem:[%s268_s24] sm:$0x1] %v541_v4 }
 0x1ee   : > { %776 = shalt.err (!%p773_p5)
}
 0x1ef   : > { %s777_s13 = scalar_lea.hbm %s990_s7, 16  ;;  %s781_s15 = scalar_lea.hbm %s1039_s5, 32 }
 0x1f0   : > { %p778_p7 = scmp.ne.s32.totalorder %s990_s7, %s777_s13  ;;  %p782_p12 = scmp.lt.u32.totalorder %s990_s7, %s1039_s5 }
 0x1f1   : > { %p783_p13 = scmp.lt.u32.totalorder %s781_s15, %s777_s13  ;;  %p785_p1 = scmp.lt.u32.totalorder %s777_s13, %s990_s7 }
 0x1f2   : > { %p779_p10 = pnand %p778_p7, %p903_p6 }
 0x1f3   : > { %p784_p0 = por %p783_p13, %p782_p12 }
 0x1f4   : > { %p780_p11 = pneg %p779_p10 }
 0x1f5   : > { %p786_p2 = por %p785_p1, %p784_p0 }
 0x1f7   : > { %p787_p3 = pnand %p786_p2, %p780_p11 }
 0x1f9   : > { %790 = shalt.err (!%p787_p3)
}
 0x1fa   : > { %718 = dma.vmem_to_hbm [thread:$0]  (%p903_p6), %s992_s26, 16, %s990_s7, %s546_s8  }
 0x1fb PF: > { %s570_s18 = sand.u32 1, %s813_s20   ;;  %p721_p4 = pnand %p621_p9, %p907_p8 }
 0x1fc   : > { %s571_s19 = scalar_lea.sflag [#allocation5], %s570_s18 }
 0x1fd   : > { %808 = dma.done.wait (!%p721_p4), %s571_s19, 16  }
 0x1fe   : > { %810 = vsyncadd (!%p721_p4), %s571_s19, 4294967280  ;;  %p16_p5 = scmp.ge.s32.totalorder %s888_s25, 4   ;;  %s1042_s20 = smov %s817_s21 }
 0x1ff   : > { %s1043_s21 = smov %s821_s22  ;;  %s1044_s22 = smov %s901_s28 }
 0x200   : > { %s1045_s23 = smov %s888_s25  ;;  %18 = sbr.rel (!%p16_p5) target bundleno = 5 (0x5), region = 118 }
 0x207   :  { %575 = vsyncpa [#allocation5], 1 }
 0x208   :  { %577 = vsyncpa [#allocation5 + $0x1], 1 }

</bundles_post_ra>
